<compile_context>
chip_gen: v6e
topology: v6e:2x2x1
jax: 0.10.0
libtpu: 0.0.40
codegen_flags: <defaults>
</compile_context>

<pallas_src>
import numpy as np

import jax
import jax.numpy as jnp
from jax.experimental import pallas as pl
from jax.experimental.pallas import tpu as pltpu


def _hbm_memcpy_kernel(x_hbm_ref, o_hbm_ref, sem):
    # Pure memcpy is HBM-bandwidth bound: one HBM->HBM DMA, no VMEM round-trip.
    cp = pltpu.make_async_copy(x_hbm_ref, o_hbm_ref, sem)
    cp.start()
    cp.wait()


def _pallas_identity_batched(x: jax.Array) -> jax.Array:
    """Single-launch identity copy of a stacked [n_systems, n_atoms, n_feat]
    buffer as one HBM->HBM DMA (no VMEM staging, no grid, no tiling).

    See the module-level scaling note for how to tile this correctly
    (2-D grid over system AND atom axes) if the payload ever grows.
    """
    return pl.pallas_call(
        _hbm_memcpy_kernel,
        out_shape=jax.ShapeDtypeStruct(x.shape, x.dtype),
        in_specs=[pl.BlockSpec(memory_space=pl.ANY)],
        out_specs=pl.BlockSpec(memory_space=pl.ANY),
        scratch_shapes=[pltpu.SemaphoreType.DMA(())],
    )(x)


class OtherModule:
    """JAX/Pallas port of metatomic_torch tests' OtherModule."""

    def __init__(self):
        # Original module has no parameters.
        pass

    def forward(self, systems, outputs, selected_atoms=None):
        # Exactly mirrors the PyTorch semantics: ignore all inputs, return {}.
        # No kernels are launched here — any compute would be dead work.
        return {}

    def requested_neighbor_lists(self):
        return [
            {
                "cutoff": 2.0,
                "full_list": True,
                "strict": False,
                "requestor": "other module",
            }
        ]


if __name__ == "__main__":
    key = jax.random.PRNGKey(0)
    # Two small synthetic "systems": per-system feature buffers [n_atoms=8, n_feat=128],
    # stacked into one [n_systems=2, 8, 128] array so the smoke test is a single launch.
    k1, k2 = jax.random.split(key)
    systems = [
        jax.random.normal(k1, (8, 128), dtype=jnp.float32),
        jax.random.normal(k2, (8, 128), dtype=jnp.float32),
    ]
    stacked = jnp.stack(systems, axis=0)  # [2, 8, 128]
    outputs = {"energy": {"quantity": "energy", "unit": "eV"}}

    module = OtherModule()

    # Explicit TPU-path smoke test: jit-wrapped so compilation/execution is
    # deterministic (the result IS consumed below, so it cannot be DCE'd).
    smoke_test = jax.jit(_pallas_identity_batched)
    y = smoke_test(stacked)
    jax.block_until_ready(y)
    assert y.shape == stacked.shape and y.dtype == stacked.dtype
    # Single host fetch for the comparison (no extra device->host sync beyond
    # the one np.asarray transfer).
    np.testing.assert_allclose(np.asarray(y), np.asarray(stacked), rtol=0.0, atol=0.0)

    # Module forward: must return an empty dict, matching the PyTorch module,
    # and launches no kernels.
    result = module.forward(systems, outputs, selected_atoms=None)
    assert result == {}

    print("KERNEL_OK")
</pallas_src>

<mosaic_0001>
module attributes {stable_mosaic.version = 11 : i64} {
  func.func @_hbm_memcpy_kernel(%arg0: memref<2x8x128xf32, #tpu.memory_space<any>>, %arg1: memref<2x8x128xf32, #tpu.memory_space<any>>, %arg2: memref<!tpu.dma_semaphore, #tpu.memory_space<semaphore_mem>>) attributes {dimension_semantics = [], scalar_prefetch = 0 : i64, scratch_operands = 1 : i64, tpu.core_type = #tpu.core_type<tc>} {
    tpu.enqueue_dma source(%arg0 : memref<2x8x128xf32, #tpu.memory_space<any>>) target(%arg1 : memref<2x8x128xf32, #tpu.memory_space<any>>) target_semaphore(%arg2 : memref<!tpu.dma_semaphore, #tpu.memory_space<semaphore_mem>>)
    tpu.wait_dma2 semaphore(%arg2 : memref<!tpu.dma_semaphore, #tpu.memory_space<semaphore_mem>>) src(%arg0 : memref<2x8x128xf32, #tpu.memory_space<any>>) dst(%arg1 : memref<2x8x128xf32, #tpu.memory_space<any>>)
    return
  }
}

</mosaic_0001>

<bundles_post_ra>
// kernel: _pallas_identity_batched.1
= control target key start
LH: loop header
LB: loop body
LE: loop exit
PB: predicated region body
PF: predicated region fallthrough
CT: control target
= control target key end

     0   :  { %s29_s6 = smov [#allocation2]   ;;  %s30_s7 = smov 131072   ;;  %s48_s0 = inlined_call_operand.hbm [shape: f32[2,8,128], index: 0, kind: input, shape index: {}]   ;;  %s49_s1 = inlined_call_operand.hbm [shape: f32[2,8,128], index: 1, kind: output, shape index: {}]  }
   0x1   :  { %s31_s8 = smov 0  }
   0x2   :  { %12 = dma.general %s48_s0, 256, %s49_s1, %s29_s6, %s30_s7, [#allocation4], %s31_s8, 0  }
   0x3   :  { %27 = dma.done.wait [#allocation2], 256 }
   0x4   :  { %28 = vsyncadd [#allocation2], 4294967040 }
   0x5   :  { %17 = vsyncmov [#allocation2] }
   0x8   :  { %s18_s13 = vpop.sfrf %17 }
   0x9   :  { %p23_p0 = scmp.ne.s32.totalorder %s18_s13, 0 }
   0xb   :  { %22 = shalt.err (%p23_p0)  }

</bundles_post_ra>
